<compile_context>
chip_gen: v7x
topology: tpu7x:2x2x1
jax: 0.10.0
libtpu: 0.0.40
codegen_flags: <defaults>
</compile_context>

<pallas_src>
import functools

import jax
import jax.numpy as jnp
from jax.experimental import pallas as pl
from jax.experimental.pallas import tpu as pltpu


# ------------------------------ Pallas kernel -------------------------------


def _conv_bn_relu_kernel(x_ref, w_ref, shift_ref, o_ref, xstk_ref,
                         *, kh, kw, wp, cin_pad):
    """Fused Conv2d (stride-1 on padded input) + folded-BN shift + ReLU.

    x_ref:     (Nb, Cin_pad, Lx)         row-flattened, zero-padded images
    w_ref:     (Cout, KH*KW*Cin_pad)     conv weight with BN scale folded in
    shift_ref: (Cout, 1) f32             beta + (conv_bias - mean) * scale
    o_ref:     (Nb, Cout, L)             L = Ho*Wp rounded up to 128-multiple
    xstk_ref:  (KH*KW*Cin_pad, L)        VMEM scratch: stacked shifted taps
    """
    nb = o_ref.shape[0]
    l = o_ref.shape[2]
    for b in range(nb):
        # Build the stacked activation once per image: each tap is a single
        # lane-shifted copy into a sublane-aligned row block of the scratch.
        for k in range(kh * kw):
            i, j = divmod(k, kw)
            off = i * wp + j                              # static -> static slice
            xstk_ref[k * cin_pad:(k + 1) * cin_pad, :] = x_ref[b, :, off:off + l]
        # One MXU matmul, K = KH*KW*Cin_pad, f32 accumulation.
        acc = jnp.dot(w_ref[...], xstk_ref[...],
                      preferred_element_type=jnp.float32)
        # Folded conv-bias + BatchNorm(eval) shift + ReLU, kept in f32 on the VPU.
        o_ref[b] = jnp.maximum(acc + shift_ref[...], 0.0).astype(o_ref.dtype)


# --------------------------------- Wrapper -----------------------------------


def conv_bn_relu(x, w_s, shift, *, ksize, cin, cin_pad,
                 stride=1, padding=0, out_dtype=None, images_per_step=1):
    """Fused Conv2d + BatchNorm2d(eval) + ReLU.  x is NCHW; returns NCHW."""
    kh, kw = ksize
    compute_dtype = w_s.dtype
    cout, k_stack = w_s.shape
    assert k_stack == kh * kw * cin_pad
    out_dtype = compute_dtype if out_dtype is None else out_dtype

    ph, pw = (padding, padding) if isinstance(padding, int) else tuple(padding)
    sh, sw = (stride, stride) if isinstance(stride, int) else tuple(stride)
    assert sh >= 1 and sw >= 1
    # Internal compute is stride-1, dilation-1, groups=1 (fail loudly otherwise).

    n, cin_x, h, w = x.shape
    assert cin_x == cin, (cin_x, cin)
    nb = images_per_step
    assert n % nb == 0, (n, nb)

    hp, wp = h + 2 * ph, w + 2 * pw
    ho1, wo1 = hp - kh + 1, wp - kw + 1          # stride-1 output size
    assert ho1 >= 1 and wo1 >= 1, "kernel larger than padded input"

    # Lane-dense flattened output: l_valid real columns, padded up to a
    # 128-multiple so all stores are unmasked full-lane vst's.
    l_valid = ho1 * wp
    l_pad = pl.cdiv(l_valid, 128) * 128
    lx = (kh - 1) * wp + (kw - 1) + l_pad        # every shifted slice in-bounds
    rows = pl.cdiv(lx, wp)                       # flattened rows needed
    lx_full = rows * wp

    # Cast first (bf16 path pads at half width), then ONE pad covering:
    # channel padding -> Cin_pad, semantic conv padding, and the extra bottom
    # rows that keep all shifted slices / the lane padding in bounds.
    # TODO(synk): move this padding into the kernel (zeroed VMEM scratch +
    # offset DMA of the raw image) to cut input-side HBM traffic further.
    xf = jnp.pad(x.astype(compute_dtype),
                 ((0, 0), (0, cin_pad - cin), (ph, ph + rows - hp), (pw, pw)))
    xf = xf.reshape(n, cin_pad, lx_full)

    kernel = functools.partial(_conv_bn_relu_kernel,
                               kh=kh, kw=kw, wp=wp, cin_pad=cin_pad)
    out_flat = pl.pallas_call(
        kernel,
        out_shape=jax.ShapeDtypeStruct((n, cout, l_pad), out_dtype),
        grid_spec=pltpu.PrefetchScalarGridSpec(
            num_scalar_prefetch=0,
            grid=(n // nb,),
            in_specs=[
                pl.BlockSpec((nb, cin_pad, lx_full), lambda i: (i, 0, 0)),
                pl.BlockSpec((cout, k_stack), lambda i: (0, 0)),
                pl.BlockSpec((cout, 1), lambda i: (0, 0)),
            ],
            out_specs=pl.BlockSpec((nb, cout, l_pad), lambda i: (i, 0, 0)),
            scratch_shapes=[pltpu.VMEM((k_stack, l_pad), compute_dtype)],
        ),
        compiler_params=pltpu.CompilerParams(
            dimension_semantics=("parallel",)),
        # TODO(synk): for large Cin / large images on v7x, add an (halo-aware)
        # L-tiling grid axis and set vmem_limit_bytes with headroom so the
        # double-buffered input block fits 32 MiB scoped / 64 MiB physical VMEM.
    )(xf, w_s, shift)

    # Drop overcompute columns; result is already Cout-major (NCHW).
    # TODO(synk): when this layer feeds another conv, keep the padded
    # lane-dense (Ho, Wp) layout as the inter-layer format and crop only once.
    out = out_flat[:, :, :l_valid].reshape(n, cout, ho1, wp)[:, :, :, :wo1]
    if sh > 1 or sw > 1:
        # TODO(synk): dedicated strided kernel (strided output columns in L)
        # instead of stride-1 overcompute + subsample (exact but wasteful).
        out = out[:, :, ::sh, ::sw]
    return out


def make_forward(folded, *, stride=1, padding=0, out_dtype=None, images_per_step=1):
    """Jit a forward fn closing over all static meta; only arrays are traced."""
    fn = functools.partial(
        conv_bn_relu,
        ksize=folded["ksize"], cin=folded["cin"], cin_pad=folded["cin_pad"],
        stride=stride, padding=padding, out_dtype=out_dtype,
        images_per_step=images_per_step)
    return jax.jit(fn)


# ----------------------- Parameter init / one-time fold ----------------------


def init_params(key, cin=4, cout=8, ksize=3):
    """Deterministic PyTorch-default-style init + nontrivial BN running stats."""
    ks = jax.random.split(key, 6)
    fan_in = cin * ksize * ksize
    bound = 1.0 / (fan_in ** 0.5)
    return {
        "conv_w": jax.random.uniform(ks[0], (cout, cin, ksize, ksize),
                                     jnp.float32, -bound, bound),
        "conv_b": jax.random.uniform(ks[1], (cout,), jnp.float32, -bound, bound),
        "bn_gamma": jax.random.uniform(ks[2], (cout,), jnp.float32, 0.5, 1.5),
        "bn_beta": jax.random.uniform(ks[3], (cout,), jnp.float32, -0.1, 0.1),
        "bn_mean": 0.1 * jax.random.normal(ks[4], (cout,), jnp.float32),
        "bn_var": jax.random.uniform(ks[5], (cout,), jnp.float32, 0.5, 1.5),
    }


def fold_params(params, eps=1e-3, compute_dtype=jnp.bfloat16):
    """One-time fold: BN scale into weights (f32), bias/BN shift, tap stacking."""
    w = params["conv_w"]                              # (Cout, Cin, KH, KW), f32
    cout, cin, kh, kw = w.shape
    scale = params["bn_gamma"] / jnp.sqrt(params["bn_var"] + eps)   # (Cout,)
    shift = params["bn_beta"] + (params["conv_b"] - params["bn_mean"]) * scale
    # Fold the BN scale into the weights in f32, BEFORE any low-precision cast.
    w_f = w * scale[:, None, None, None]
    # Stack taps: (Cout, KH, KW, Cin_pad) -> (Cout, KH*KW*Cin_pad), with Cin
    # padded to the sublane tile so the kernel's scratch copies stay aligned.
    sublane = 8 if jnp.dtype(compute_dtype).itemsize == 4 else 16
    cin_pad = pl.cdiv(cin, sublane) * sublane
    w_f = jnp.transpose(w_f, (0, 2, 3, 1))
    w_f = jnp.pad(w_f, ((0, 0), (0, 0), (0, 0), (0, cin_pad - cin)))
    w_s = w_f.reshape(cout, kh * kw * cin_pad).astype(compute_dtype)
    return {
        "w_s": w_s,                                            # compute dtype
        "shift": shift.reshape(cout, 1).astype(jnp.float32),   # f32 epilogue
        "ksize": (kh, kw),
        "cin": cin,
        "cin_pad": cin_pad,
    }


# ------------------------------- Reference -----------------------------------


def reference_forward(params, x, *, stride=1, padding=0, eps=1e-3):
    """Plain-JAX Conv2d + BatchNorm2d(eval) + ReLU, full f32 precision."""
    ph, pw = (padding, padding) if isinstance(padding, int) else tuple(padding)
    out = jax.lax.conv_general_dilated(
        x, params["conv_w"], window_strides=(stride, stride),
        padding=((ph, ph), (pw, pw)),
        dimension_numbers=("NCHW", "OIHW", "NCHW"),
        precision=jax.lax.Precision.HIGHEST)
    out = out + params["conv_b"][None, :, None, None]
    inv = params["bn_gamma"] / jnp.sqrt(params["bn_var"] + eps)
    out = (out - params["bn_mean"][None, :, None, None]) * inv[None, :, None, None]
    out = out + params["bn_beta"][None, :, None, None]
    return jnp.maximum(out, 0.0)


# --------------------------------- Main ---------------------------------------


if __name__ == "__main__":
    key = jax.random.PRNGKey(0)
    kx, kp = jax.random.split(key)

    N, CIN, H, W = 2, 4, 16, 16
    COUT, KSIZE, PAD, STRIDE = 8, 3, 1, 1
    EPS = 1e-3   # matches nn.BatchNorm2d(eps=0.001)

    x = jax.random.normal(kx, (N, CIN, H, W), jnp.float32)
    params = init_params(kp, CIN, COUT, KSIZE)

    # One-time folds outside jit (fold in f32, then cast).
    folded_bf16 = fold_params(params, eps=EPS, compute_dtype=jnp.bfloat16)
    folded_f32 = fold_params(params, eps=EPS, compute_dtype=jnp.float32)

    fwd_bf16 = make_forward(folded_bf16, stride=STRIDE, padding=PAD)          # bf16 in/out (default)
    fwd_f32 = make_forward(folded_f32, stride=STRIDE, padding=PAD,
                           out_dtype=jnp.float32)                             # f32 reference-precision path

    out_bf16 = jax.block_until_ready(
        fwd_bf16(x, folded_bf16["w_s"], folded_bf16["shift"]))
    out_f32 = jax.block_until_ready(
        fwd_f32(x, folded_f32["w_s"], folded_f32["shift"]))
    ref = reference_forward(params, x, stride=STRIDE, padding=PAD, eps=EPS)

    assert out_f32.shape == ref.shape == (N, COUT, H, W), (out_f32.shape, ref.shape)
    assert out_bf16.shape == ref.shape and out_bf16.dtype == jnp.bfloat16
    assert jnp.all(jnp.isfinite(out_f32))
    assert jnp.all(jnp.isfinite(out_bf16.astype(jnp.float32)))
    assert jnp.allclose(out_f32, ref, rtol=1e-3, atol=1e-3), \
        float(jnp.max(jnp.abs(out_f32 - ref)))
    # Loose tolerance for the bf16-operand / f32-accumulate / bf16-output path.
    assert jnp.allclose(out_bf16.astype(jnp.float32), ref, rtol=1e-1, atol=1e-1), \
        float(jnp.max(jnp.abs(out_bf16.astype(jnp.float32) - ref)))
    print("KERNEL_OK")
</pallas_src>

<mosaic_0001>
module attributes {stable_mosaic.version = 11 : i64} {
  func.func @_conv_bn_relu_kernel(%arg0: i32, %arg1: memref<1x16x432xbf16, #tpu.memory_space<vmem>>, %arg2: memref<8x144xbf16, #tpu.memory_space<vmem>>, %arg3: memref<8x1xf32, #tpu.memory_space<vmem>>, %arg4: memref<1x8x384xbf16, #tpu.memory_space<vmem>>, %arg5: memref<144x384xbf16, #tpu.memory_space<vmem>>) attributes {dimension_semantics = [#tpu.dimension_semantics<parallel>], iteration_bounds = array<i64: 2>, scalar_prefetch = 0 : i64, scratch_operands = 1 : i64, tpu.core_type = #tpu.core_type<tc>, window_params = [{transform_indices = @transform_0, window_bounds = array<i64: 1, 16, 432>}, {pipeline_mode = #tpu.pipeline_mode<synchronous>, transform_indices = @transform_1, window_bounds = array<i64: 8, 144>}, {pipeline_mode = #tpu.pipeline_mode<synchronous>, transform_indices = @transform_2, window_bounds = array<i64: 8, 1>}, {transform_indices = @transform_3, window_bounds = array<i64: 1, 8, 384>}]} {
    %c0 = arith.constant 0 : index
    %c0_0 = arith.constant 0 : index
    %c0_1 = arith.constant 0 : index
    %0 = vector.load %arg1[%c0, %c0_0, %c0_1] : memref<1x16x432xbf16, #tpu.memory_space<vmem>>, vector<1x16x384xbf16>
    %1 = vector.shape_cast %0 : vector<1x16x384xbf16> to vector<16x384xbf16>
    %c0_2 = arith.constant 0 : index
    %c0_3 = arith.constant 0 : index
    %2 = vector.load %arg5[%c0_2, %c0_3] : memref<144x384xbf16, #tpu.memory_space<vmem>>, vector<16x384xbf16>
    tpu.vector_store %arg5[%c0_2, %c0_3], %1 {strides = array<i32>} : memref<144x384xbf16, #tpu.memory_space<vmem>>, vector<16x384xbf16>,
    %c0_4 = arith.constant 0 : index
    %c0_5 = arith.constant 0 : index
    %c1 = arith.constant 1 : index
    %3 = vector.load %arg1[%c0_4, %c0_5, %c1] : memref<1x16x432xbf16, #tpu.memory_space<vmem>>, vector<1x16x384xbf16>
    %4 = vector.shape_cast %3 : vector<1x16x384xbf16> to vector<16x384xbf16>
    %c16 = arith.constant 16 : index
    %c0_6 = arith.constant 0 : index
    %5 = vector.load %arg5[%c16, %c0_6] : memref<144x384xbf16, #tpu.memory_space<vmem>>, vector<16x384xbf16>
    tpu.vector_store %arg5[%c16, %c0_6], %4 {strides = array<i32>} : memref<144x384xbf16, #tpu.memory_space<vmem>>, vector<16x384xbf16>,
    %c0_7 = arith.constant 0 : index
    %c0_8 = arith.constant 0 : index
    %c2 = arith.constant 2 : index
    %6 = vector.load %arg1[%c0_7, %c0_8, %c2] : memref<1x16x432xbf16, #tpu.memory_space<vmem>>, vector<1x16x384xbf16>
    %7 = vector.shape_cast %6 : vector<1x16x384xbf16> to vector<16x384xbf16>
    %c32 = arith.constant 32 : index
    %c0_9 = arith.constant 0 : index
    %8 = vector.load %arg5[%c32, %c0_9] : memref<144x384xbf16, #tpu.memory_space<vmem>>, vector<16x384xbf16>
    tpu.vector_store %arg5[%c32, %c0_9], %7 {strides = array<i32>} : memref<144x384xbf16, #tpu.memory_space<vmem>>, vector<16x384xbf16>,
    %c0_10 = arith.constant 0 : index
    %c0_11 = arith.constant 0 : index
    %c18 = arith.constant 18 : index
    %9 = vector.load %arg1[%c0_10, %c0_11, %c18] : memref<1x16x432xbf16, #tpu.memory_space<vmem>>, vector<1x16x384xbf16>
    %10 = vector.shape_cast %9 : vector<1x16x384xbf16> to vector<16x384xbf16>
    %c48 = arith.constant 48 : index
    %c0_12 = arith.constant 0 : index
    %11 = vector.load %arg5[%c48, %c0_12] : memref<144x384xbf16, #tpu.memory_space<vmem>>, vector<16x384xbf16>
    tpu.vector_store %arg5[%c48, %c0_12], %10 {strides = array<i32>} : memref<144x384xbf16, #tpu.memory_space<vmem>>, vector<16x384xbf16>,
    %c0_13 = arith.constant 0 : index
    %c0_14 = arith.constant 0 : index
    %c19 = arith.constant 19 : index
    %12 = vector.load %arg1[%c0_13, %c0_14, %c19] : memref<1x16x432xbf16, #tpu.memory_space<vmem>>, vector<1x16x384xbf16>
    %13 = vector.shape_cast %12 : vector<1x16x384xbf16> to vector<16x384xbf16>
    %c64 = arith.constant 64 : index
    %c0_15 = arith.constant 0 : index
    %14 = vector.load %arg5[%c64, %c0_15] : memref<144x384xbf16, #tpu.memory_space<vmem>>, vector<16x384xbf16>
    tpu.vector_store %arg5[%c64, %c0_15], %13 {strides = array<i32>} : memref<144x384xbf16, #tpu.memory_space<vmem>>, vector<16x384xbf16>,
    %c0_16 = arith.constant 0 : index
    %c0_17 = arith.constant 0 : index
    %c20 = arith.constant 20 : index
    %15 = vector.load %arg1[%c0_16, %c0_17, %c20] : memref<1x16x432xbf16, #tpu.memory_space<vmem>>, vector<1x16x384xbf16>
    %16 = vector.shape_cast %15 : vector<1x16x384xbf16> to vector<16x384xbf16>
    %c80 = arith.constant 80 : index
    %c0_18 = arith.constant 0 : index
    %17 = vector.load %arg5[%c80, %c0_18] : memref<144x384xbf16, #tpu.memory_space<vmem>>, vector<16x384xbf16>
    tpu.vector_store %arg5[%c80, %c0_18], %16 {strides = array<i32>} : memref<144x384xbf16, #tpu.memory_space<vmem>>, vector<16x384xbf16>,
    %c0_19 = arith.constant 0 : index
    %c0_20 = arith.constant 0 : index
    %c36 = arith.constant 36 : index
    %18 = vector.load %arg1[%c0_19, %c0_20, %c36] : memref<1x16x432xbf16, #tpu.memory_space<vmem>>, vector<1x16x384xbf16>
    %19 = vector.shape_cast %18 : vector<1x16x384xbf16> to vector<16x384xbf16>
    %c96 = arith.constant 96 : index
    %c0_21 = arith.constant 0 : index
    %20 = vector.load %arg5[%c96, %c0_21] : memref<144x384xbf16, #tpu.memory_space<vmem>>, vector<16x384xbf16>
    tpu.vector_store %arg5[%c96, %c0_21], %19 {strides = array<i32>} : memref<144x384xbf16, #tpu.memory_space<vmem>>, vector<16x384xbf16>,
    %c0_22 = arith.constant 0 : index
    %c0_23 = arith.constant 0 : index
    %c37 = arith.constant 37 : index
    %21 = vector.load %arg1[%c0_22, %c0_23, %c37] : memref<1x16x432xbf16, #tpu.memory_space<vmem>>, vector<1x16x384xbf16>
    %22 = vector.shape_cast %21 : vector<1x16x384xbf16> to vector<16x384xbf16>
    %c112 = arith.constant 112 : index
    %c0_24 = arith.constant 0 : index
    %23 = vector.load %arg5[%c112, %c0_24] : memref<144x384xbf16, #tpu.memory_space<vmem>>, vector<16x384xbf16>
    tpu.vector_store %arg5[%c112, %c0_24], %22 {strides = array<i32>} : memref<144x384xbf16, #tpu.memory_space<vmem>>, vector<16x384xbf16>,
    %c0_25 = arith.constant 0 : index
    %c0_26 = arith.constant 0 : index
    %c38 = arith.constant 38 : index
    %24 = vector.load %arg1[%c0_25, %c0_26, %c38] : memref<1x16x432xbf16, #tpu.memory_space<vmem>>, vector<1x16x384xbf16>
    %25 = vector.shape_cast %24 : vector<1x16x384xbf16> to vector<16x384xbf16>
    %c128 = arith.constant 128 : index
    %c0_27 = arith.constant 0 : index
    %26 = vector.load %arg5[%c128, %c0_27] : memref<144x384xbf16, #tpu.memory_space<vmem>>, vector<16x384xbf16>
    tpu.vector_store %arg5[%c128, %c0_27], %25 {strides = array<i32>} : memref<144x384xbf16, #tpu.memory_space<vmem>>, vector<16x384xbf16>,
    %c0_28 = arith.constant 0 : index
    %c0_29 = arith.constant 0 : index
    %27 = vector.load %arg2[%c0_28, %c0_29] : memref<8x144xbf16, #tpu.memory_space<vmem>>, vector<8x144xbf16>
    %c0_30 = arith.constant 0 : index
    %c0_31 = arith.constant 0 : index
    %28 = vector.load %arg5[%c0_30, %c0_31] : memref<144x384xbf16, #tpu.memory_space<vmem>>, vector<144x384xbf16>
    %cst = arith.constant dense<0.000000e+00> : vector<8x384xf32>
    %29 = tpu.matmul %27, %28, %cst {dimension_numbers = #tpu.dot_dimension_numbers<[1], [0], [0], [1], [0, 0, 1, 1], [], []>} : vector<8x144xbf16>, vector<144x384xbf16>, vector<8x384xf32> -> vector<8x384xf32>
    %c0_32 = arith.constant 0 : index
    %c0_33 = arith.constant 0 : index
    %30 = vector.load %arg3[%c0_32, %c0_33] : memref<8x1xf32, #tpu.memory_space<vmem>>, vector<8x1xf32>
    %31 = vector.broadcast %30 : vector<8x1xf32> to vector<8x384xf32>
    %32 = arith.addf %29, %31 : vector<8x384xf32>
    %cst_34 = arith.constant 0.000000e+00 : f32
    %33 = vector.broadcast %cst_34 : f32 to vector<8x384xf32>
    %34 = arith.maximumf %32, %33 : vector<8x384xf32>
    %35 = arith.truncf %34 : vector<8x384xf32> to vector<8x384xbf16>
    %c0_35 = arith.constant 0 : index
    %c0_36 = arith.constant 0 : index
    %c0_37 = arith.constant 0 : index
    %36 = vector.load %arg4[%c0_35, %c0_36, %c0_37] : memref<1x8x384xbf16, #tpu.memory_space<vmem>>, vector<1x8x384xbf16>
    %37 = vector.shape_cast %36 : vector<1x8x384xbf16> to vector<8x384xbf16>
    %38 = vector.shape_cast %35 : vector<8x384xbf16> to vector<1x8x384xbf16>
    tpu.vector_store %arg4[%c0_35, %c0_36, %c0_37], %38 {strides = array<i32>} : memref<1x8x384xbf16, #tpu.memory_space<vmem>>, vector<1x8x384xbf16>,
    return
  }
  func.func @transform_0(%arg0: i32) -> (i32, i32, i32) {
    %c0_i32 = arith.constant 0 : i32
    %c0_i32_0 = arith.constant 0 : i32
    %c0_i32_1 = arith.constant 0 : i32
    return %arg0, %c0_i32, %c0_i32_0 : i32, i32, i32
  }
  func.func @transform_1(%arg0: i32) -> (i32, i32) {
    %c0_i32 = arith.constant 0 : i32
    %c0_i32_0 = arith.constant 0 : i32
    %c0_i32_1 = arith.constant 0 : i32
    return %c0_i32, %c0_i32_0 : i32, i32
  }
  func.func @transform_2(%arg0: i32) -> (i32, i32) {
    %c0_i32 = arith.constant 0 : i32
    %c0_i32_0 = arith.constant 0 : i32
    %c0_i32_1 = arith.constant 0 : i32
    return %c0_i32, %c0_i32_0 : i32, i32
  }
  func.func @transform_3(%arg0: i32) -> (i32, i32, i32) {
    %c0_i32 = arith.constant 0 : i32
    %c0_i32_0 = arith.constant 0 : i32
    %c0_i32_1 = arith.constant 0 : i32
    return %arg0, %c0_i32, %c0_i32_0 : i32, i32, i32
  }
}

</mosaic_0001>

<bundles_post_ra>
// kernel: conv_bn_relu.1
= control target key start
LH: loop header
LB: loop body
LE: loop exit
PB: predicated region body
PF: predicated region fallthrough
CT: control target
= control target key end

     0   :  { %s816_s12 = smov 0   ;;  %s859_s0 = inlined_call_operand.vmem [shape: bf16[2,16,432], index: 0, kind: input, shape index: {}]   ;;  %s860_s1 = inlined_call_operand.vmem [shape: bf16[8,144], index: 1, kind: input, shape index: {}]   ;;  %s861_s2 = inlined_call_operand.vmem [shape: f32[8,1], index: 2, kind: input, shape index: {}]   ;;  %s862_s3 = inlined_call_operand.vmem [shape: bf16[2,8,384], index: 3, kind: output, shape index: {}]  }
   0x1 LB: > { %s697_s13 = sadd.s32 4294967295, %s785_s12   ;;  %p701_p0 = scmp.ge.s32.totalorder %s785_s12, 1  ;;  %s785_s12 = sphi %s816_s12, %s13_s12  }
   0x2   : > { %p137_p1 = scmp.lt.s32.totalorder %s785_s12, 3 }
   0x4   : > { %p138_p2 = pnand %p701_p0, %p137_p1 }
   0x5   : > { %p161_p3 = scmp.lt.s32.totalorder (!%p138_p2), %s697_s13, 1  ;;  %v787_v0 = vmov (!%p138_p2), 0   ;;  %s788_s18 = smov (!%p138_p2), 127   ;;  %v836_v6 = vld [vmem:[%s860_s1] sm:$0xff] (!%p138_p2)  ;;  %vm539_vm0 = vcmask (!%p138_p2), 130048   ;;  %vm223_vm1 = vcmask (!%p138_p2), 1039360  }
   0x6   : > { %141 = sbr.rel (%p138_p2) target bundleno = 416 (0x1a0), region = 32  ;;  %584 = vmatprep.subr.bf16.mxu1 (!%p138_p2), %v787_v0  ;;  %769 = vset.pattern.permute.xlu0 (!%p138_p2), %v787_v0  ;;  %s789_s19 = smov (!%p138_p2), 126   ;;  %v741_v7 = vcombine.high (!%p138_p2), %v836_v6, %v836_v6  ;;  %v527_v8 = vld [vmem:[%s861_s2] sm:$0xff] (!%p138_p2)  ;;  %vm261_vm2 = vcmask (!%p138_p2), 1031168   ;;  %vm299_vm3 = vcmask (!%p138_p2), 900096   ;;  %vm337_vm4 = vcmask (!%p138_p2), 891904  }
   0x7   : > { %s790_s20 = smov (!%p138_p2), 110   ;;  %s791_s21 = smov (!%p138_p2), 109   ;;  %vm375_vm5 = vcmask (!%p138_p2), 883712   ;;  %vm413_vm6 = vcmask (!%p138_p2), 752640   ;;  %vm451_vm7 = vcmask (!%p138_p2), 744448   ;;  %vm489_vm8 = vcmask (!%p138_p2), 736256  }
   0x8   : > { %s792_s22 = smov (!%p138_p2), 108   ;;  %s793_s23 = smov (!%p138_p2), 92   ;;  %742 = vmatprep.mubr.msk.bf16.mxu0 (!%p138_p2), %vm539_vm0, %v741_v7  ;;  %743 = vmatprep.mubr.msk.bf16.mxu1 (!%p138_p2), %vm539_vm0, %v741_v7 }
   0x9   : > { %s794_s24 = smov (!%p138_p2), 91   ;;  %s795_s27 = smov (!%p138_p2), 90  }
   0xd   : > { %s864_s13 = smov (!%p161_p3, %s697_s13), 1 }
   0xe   : > { %s748_s14 = sshll.u32 %s864_s13, 5  ;;  %s751_s30 = smul.u32 12, %s864_s13 }
   0xf   : > { %s165_s17 = scalar_lea.vmem %s859_s0, %s748_s14 }
  0x10   : > { %v770_v1 = vld [vmem:[%s165_s17 + $0x4] ss:$16 sps:$4 sm:$0xff]   ;;  %v772_v2 = vld [vmem:[%s165_s17] ss:$16 sps:$4 sm:$0xff]   ;;  %v773_v3 = vld [vmem:[%s165_s17 + $0x8] ss:$16 sps:$4 sm:$0xff]   ;;  %s170_s6 = scalar_lea.vmem %s862_s3, %s751_s30 }
  0x11   : > { %217 = vrot.lane.b32.xlu0 %v770_v1, %s788_s18  ;;  %543 = vmatprep.subr.bf16.mxu0 %v770_v1  ;;  %v775_v4 = vld [vmem:[%s165_s17 + $0xc] ss:$16 sps:$4 sm:$0xff]   ;;  %v776_v5 = vld [vmem:[%s165_s17 + $0x8] ss:$16 sps:$4 sm:$0xff]  }
  0x12   : > { %215 = vrot.lane.b32.xlu1 %v772_v2, %s788_s18  ;;  %544 = vmatpush1.bf16.msra.mxu0 %v772_v2 }
  0x13   : > { %585 = vmatpush1.bf16.msra.mxu1 %v776_v5 }
  0x14   : > { %586 = vmatprep.subr.bf16.mxu1 %v787_v0 }
  0x15   : > { %219 = vrot.lane.b32.xlu0 %v773_v3, %s788_s18 }
  0x16   : > { %221 = vrot.lane.b32.xlu1 %v775_v4, %s788_s18 }
  0x19   : > { %255 = vrot.lane.b32.xlu0 %v770_v1, %s789_s19 }
  0x1a   : > { %257 = vrot.lane.b32.xlu1 %v773_v3, %s789_s19 }
  0x1d   : > { %253 = vrot.lane.b32.xlu0 %v772_v2, %s789_s19 }
  0x1e   : > { %259 = vrot.lane.b32.xlu1 %v775_v4, %s789_s19 }
  0x21   : > { %293 = vrot.lane.b32.xlu0 %v770_v1, %s790_s20 }
  0x22   : > { %295 = vrot.lane.b32.xlu1 %v773_v3, %s790_s20 }
  0x25   : > { %291 = vrot.lane.b32.xlu0 %v772_v2, %s790_s20 }
  0x26   : > { %297 = vrot.lane.b32.xlu1 %v775_v4, %s790_s20 }
  0x29   : > { %331 = vrot.lane.b32.xlu0 %v770_v1, %s791_s21 }
  0x2a   : > { %333 = vrot.lane.b32.xlu1 %v773_v3, %s791_s21 }
  0x2d   : > { %329 = vrot.lane.b32.xlu0 %v772_v2, %s791_s21 }
  0x2e   : > { %335 = vrot.lane.b32.xlu1 %v775_v4, %s791_s21 }
  0x31   : > { %369 = vrot.lane.b32.xlu0 %v770_v1, %s792_s22 }
  0x32   : > { %371 = vrot.lane.b32.xlu1 %v773_v3, %s792_s22 }
  0x35   : > { %367 = vrot.lane.b32.xlu0 %v772_v2, %s792_s22 }
  0x36   : > { %373 = vrot.lane.b32.xlu1 %v775_v4, %s792_s22 }
  0x39   : > { %407 = vrot.lane.b32.xlu0 %v770_v1, %s793_s23 }
  0x3a   : > { %409 = vrot.lane.b32.xlu1 %v773_v3, %s793_s23 }
  0x3d   : > { %405 = vrot.lane.b32.xlu0 %v772_v2, %s793_s23 }
  0x3e   : > { %411 = vrot.lane.b32.xlu1 %v775_v4, %s793_s23 }
  0x41   : > { %445 = vrot.lane.b32.xlu0 %v770_v1, %s794_s24 }
  0x42   : > { %447 = vrot.lane.b32.xlu1 %v773_v3, %s794_s24 }
  0x45   : > { %443 = vrot.lane.b32.xlu0 %v772_v2, %s794_s24 }
  0x46   : > { %449 = vrot.lane.b32.xlu1 %v775_v4, %s794_s24 }
  0x49   : > { %483 = vrot.lane.b32.xlu0 %v770_v1, %s795_s27  ;;  %v740_v1 = vcombine.low %v836_v6, %v836_v6 }
  0x4a   : > { %485 = vrot.lane.b32.xlu1 %v773_v3, %s795_s27 }
  0x4d   : > { %481 = vrot.lane.b32.xlu0 %v772_v2, %s795_s27 }
  0x4e   : > { %487 = vrot.lane.b32.xlu1 %v775_v4, %s795_s27 }
  0x51   : > { %530 = vperm.xlu0 %769, %v527_v8  }
  0x83   : > { %v218_v9 = vpop.permute.xlu0 %217 }
  0x84   : > { %v216_v10 = vpop.permute.xlu1 %215 }
  0x85   : > { %v224_v15 = vsel %vm223_vm1, %v216_v10, %v218_v9 }
  0x87   : > { %v220_v11 = vpop.permute.xlu0 %219 }
  0x88   : > { %v222_v12 = vpop.permute.xlu1 %221  ;;  %v225_v13 = vsel %vm223_vm1, %v218_v9, %v220_v11 }
  0x89   : > { %545 = vmatprep.subr.bf16.mxu0 %v225_v13  ;;  %v226_v14 = vsel %vm223_vm1, %v220_v11, %v222_v12 }
  0x8a   : > { %587 = vmatpush1.bf16.msra.mxu1 %v226_v14  ;;  %546 = vmatpush1.bf16.msra.mxu0 %v224_v15 }
  0x8b   : > { %v256_v16 = vpop.permute.xlu0 %255  ;;  %588 = vmatprep.subr.bf16.mxu1 %v787_v0 }
  0x8c   : > { %v258_v17 = vpop.permute.xlu1 %257 }
  0x8d   : > { %v263_v18 = vsel %vm261_vm2, %v256_v16, %v258_v17 }
  0x8e   : > { %547 = vmatprep.subr.bf16.mxu0 %v263_v18 }
  0x8f   : > { %v254_v19 = vpop.permute.xlu0 %253 }
  0x90   : > { %v260_v20 = vpop.permute.xlu1 %259  ;;  %v262_v21 = vsel %vm261_vm2, %v254_v19, %v256_v16 }
  0x91   : > { %548 = vmatpush1.bf16.msra.mxu0 %v262_v21  ;;  %v264_v22 = vsel %vm261_vm2, %v258_v17, %v260_v20 }
  0x92   : > { %589 = vmatpush1.bf16.msra.mxu1 %v264_v22 }
  0x93   : > { %v294_v23 = vpop.permute.xlu0 %293  ;;  %590 = vmatprep.subr.bf16.mxu1 %v787_v0 }
  0x94   : > { %v296_v24 = vpop.permute.xlu1 %295 }
  0x95   : > { %v301_v25 = vsel %vm299_vm3, %v294_v23, %v296_v24 }
  0x96   : > { %549 = vmatprep.subr.bf16.mxu0 %v301_v25 }
  0x97   : > { %v292_v26 = vpop.permute.xlu0 %291 }
  0x98   : > { %v298_v27 = vpop.permute.xlu1 %297  ;;  %v300_v28 = vsel %vm299_vm3, %v292_v26, %v294_v23 }
  0x99   : > { %550 = vmatpush1.bf16.msra.mxu0 %v300_v28  ;;  %v302_v29 = vsel %vm299_vm3, %v296_v24, %v298_v27 }
  0x9a   : > { %591 = vmatpush1.bf16.msra.mxu1 %v302_v29 }
  0x9b   : > { %v332_v30 = vpop.permute.xlu0 %331  ;;  %592 = vmatprep.subr.bf16.mxu1 %v787_v0 }
  0x9c   : > { %v334_v31 = vpop.permute.xlu1 %333 }
  0x9d   : > { %v339_v32 = vsel %vm337_vm4, %v332_v30, %v334_v31 }
  0x9e   : > { %551 = vmatprep.subr.bf16.mxu0 %v339_v32 }
  0x9f   : > { %v330_v33 = vpop.permute.xlu0 %329 }
  0xa0   : > { %v336_v34 = vpop.permute.xlu1 %335  ;;  %v338_v35 = vsel %vm337_vm4, %v330_v33, %v332_v30 }
  0xa1   : > { %552 = vmatpush1.bf16.msra.mxu0 %v338_v35  ;;  %v340_v36 = vsel %vm337_vm4, %v334_v31, %v336_v34 }
  0xa2   : > { %593 = vmatpush1.bf16.msra.mxu1 %v340_v36 }
  0xa3   : > { %v370_v37 = vpop.permute.xlu0 %369  ;;  %594 = vmatprep.subr.bf16.mxu1 %v787_v0 }
  0xa4   : > { %v372_v38 = vpop.permute.xlu1 %371 }
  0xa5   : > { %v377_v39 = vsel %vm375_vm5, %v370_v37, %v372_v38 }
  0xa6   : > { %553 = vmatprep.subr.bf16.mxu0 %v377_v39 }
  0xa7   : > { %v368_v40 = vpop.permute.xlu0 %367 }
  0xa8   : > { %v374_v41 = vpop.permute.xlu1 %373  ;;  %v376_v42 = vsel %vm375_vm5, %v368_v40, %v370_v37 }
  0xa9   : > { %554 = vmatpush1.bf16.msra.mxu0 %v376_v42  ;;  %v378_v43 = vsel %vm375_vm5, %v372_v38, %v374_v41 }
  0xaa   : > { %595 = vmatpush1.bf16.msra.mxu1 %v378_v43 }
  0xab   : > { %v408_v44 = vpop.permute.xlu0 %407  ;;  %596 = vmatprep.subr.bf16.mxu1 %v787_v0 }
  0xac   : > { %v410_v45 = vpop.permute.xlu1 %409 }
  0xad   : > { %v415_v46 = vsel %vm413_vm6, %v408_v44, %v410_v45 }
  0xae   : > { %555 = vmatprep.subr.bf16.mxu0 %v415_v46 }
  0xaf   : > { %v406_v47 = vpop.permute.xlu0 %405 }
  0xb0   : > { %v412_v48 = vpop.permute.xlu1 %411  ;;  %v414_v49 = vsel %vm413_vm6, %v406_v47, %v408_v44 }
  0xb1   : > { %556 = vmatpush1.bf16.msra.mxu0 %v414_v49  ;;  %v416_v50 = vsel %vm413_vm6, %v410_v45, %v412_v48 }
  0xb2   : > { %597 = vmatpush1.bf16.msra.mxu1 %v416_v50 }
  0xb3   : > { %v446_v51 = vpop.permute.xlu0 %445  ;;  %598 = vmatprep.subr.bf16.mxu1 %v787_v0 }
  0xb4   : > { %v448_v52 = vpop.permute.xlu1 %447 }
  0xb5   : > { %v453_v53 = vsel %vm451_vm7, %v446_v51, %v448_v52 }
  0xb6   : > { %557 = vmatprep.subr.bf16.mxu0 %v453_v53 }
  0xb7   : > { %v444_v54 = vpop.permute.xlu0 %443 }
  0xb8   : > { %v450_v55 = vpop.permute.xlu1 %449  ;;  %v452_v56 = vsel %vm451_vm7, %v444_v54, %v446_v51 }
  0xb9   : > { %558 = vmatpush1.bf16.msra.mxu0 %v452_v56  ;;  %v454_v57 = vsel %vm451_vm7, %v448_v52, %v450_v55 }
  0xba   : > { %599 = vmatpush1.bf16.msra.mxu1 %v454_v57 }
  0xbb   : > { %v484_v58 = vpop.permute.xlu0 %483  ;;  %600 = vmatprep.subr.bf16.mxu1 %v787_v0 }
  0xbc   : > { %v486_v59 = vpop.permute.xlu1 %485 }
  0xbd   : > { %v491_v60 = vsel %vm489_vm8, %v484_v58, %v486_v59 }
  0xbe   : > { %559 = vmatprep.subr.bf16.mxu0 %v491_v60 }
  0xbf   : > { %v482_v61 = vpop.permute.xlu0 %481 }
  0xc0   : > { %v488_v62 = vpop.permute.xlu1 %487  ;;  %v490_v63 = vsel %vm489_vm8, %v482_v61, %v484_v58 }
  0xc1   : > { %560 = vmatpush1.bf16.msra.mxu0 %v490_v63  ;;  %v492_v2 = vsel %vm489_vm8, %v486_v59, %v488_v62 }
  0xc2   : > { %601 = vmatpush1.bf16.msra.mxu1 %v492_v2 }
  0xc4   : > { %576 = vmatmul.mubr.bf16.vlgmr.msra.gmra.mrb[0].mxu0 %v740_v1 }
  0xc5   : > { %617 = vmatmul.mubr.bf16.vlgmr.msra.gmra.mrb[0].mxu1 %v740_v1 }
  0xd0   : > { %v531_v3 = vpop.permute.xlu0 %530 }
 0x197   : > { %v577_v4 = vpop.f32.mrb[0].mxu0 }
 0x198   : > { %v578_v5 = vadd.f32 %v577_v4, %v531_v3  ;;  %v618_v0 = vpop.f32.mrb[0].mxu1  ;;  %v579_v7 = vpop.f32.mrb[1].mxu0 }
 0x199   : > { %v619_v8 = vadd.f32 %v618_v0, %v531_v3  ;;  %v580_v9 = vadd.f32 %v579_v7, %v531_v3  ;;  %v620_v10 = vpop.f32.mrb[1].mxu1  ;;  %v581_v11 = vpop.f32.mrb[2].mxu0 }
 0x19a   : > { %v624_v12 = vmax.f32 %v578_v5, 0.0  ;;  %v621_v13 = vpop.f32.mrb[2].mxu1  ;;  %v582_v14 = vpop.f32.mrb[3].mxu0 }
 0x19b   : > { %v626_v15 = vmax.f32 %v619_v8, 0.0  ;;  %v625_v6 = vmax.f32 %v580_v9, 0.0  ;;  %v622_v16 = vpop.f32.mrb[3].mxu1 }
 0x19d   : > { %v750_v17 = vpack.c.bf16 %v626_v15, %v626_v15  ;;  %v749_v18 = vpack.c.bf16 %v625_v6, %v624_v12 }
 0x19f   : > { %641 = vst [vmem:[%s170_s6 + $0x8] sm:$0xf] %v750_v17  ;;  %640 = vst [vmem:[%s170_s6] sm:$0xff] %v749_v18 }
 0x1a0 PF: > { %s13_s12 = sadd.s32 1, %s785_s12  }
 0x1a1   : > { %p10_p4 = scmp.ge.s32.totalorder %s13_s12, 4  }
 0x1a3   :  { %12 = sbr.rel (!%p10_p4) target bundleno = 1 (0x1), region = 62 }

</bundles_post_ra>
